<compile_context>
chip_gen: v7x
topology: tpu7x:2x2x1
jax: 0.10.0
libtpu: 0.0.40
codegen_flags: <defaults>
</compile_context>

<pallas_src>
import jax
import jax.numpy as jnp
from jax.experimental import pallas as pl
from jax.experimental.pallas import tpu as pltpu

LANE = 128            # all channel dims are processed as one 128-lane tile
TARGET_M_ROWS = 512   # aim for BB*L >= ~512 rows per MXU matmul


def _round_up(x, m):
    return ((x + m - 1) // m) * m


def _const_index_map(ndim):
    return lambda b: (0,) * ndim


def _weight_spec(a):
    # Constant across the grid -> single buffer (halves weight VMEM).
    return pl.BlockSpec(a.shape, _const_index_map(a.ndim),
                        pipeline_mode=pl.Buffered(1))


# ----------------------------------------------------------------------------
# Fused kernel: all TemporalBlocks + final Linear in one body.
# ----------------------------------------------------------------------------
def _make_fused_kernel(block_meta, K, BB, L, CIN, CP, OFF, LT,
                       compute_dtype, split_k):
    """block_meta: tuple of (dilation, has_downsample) per TemporalBlock."""
    M = BB * L

    def kernel(*refs):
        it = iter(refs)
        x_ref = next(it)
        blk_refs = []
        for (_dil, has_ds) in block_meta:
            n = 6 if has_ds else 4
            blk_refs.append([next(it) for _ in range(n)])
        wl_ref = next(it)
        bl_ref = next(it)
        out_ref = next(it)
        hpad_ref = next(it)  # (BB, LT, CP) halo scratch, compute dtype

        # Zero halos AND valid-region lanes >= CIN (layer-0 widening), then
        # masked-store the unpadded input into the first CIN lanes.
        # (Re-done every grid step: with "parallel" semantics each core owns
        #  its own scratch, so a program_id==0 one-time init would be wrong.)
        hpad_ref[...] = jnp.zeros(hpad_ref.shape, hpad_ref.dtype)
        hpad_ref[:, OFF:OFF + L, :CIN] = x_ref[...].astype(compute_dtype)

        def conv_from_hpad(w_ref, b_ref, dil, relu):
            """Dilated conv (+chomp) reading its input from the halo scratch.

            Returns f32 (M, CP)."""
            p = (K - 1) * dil
            front = p if (p % 2 != 0) else p // 2     # Chomp1d of the spec
            base = OFF - front
            taps = [hpad_ref[:, base + j * dil: base + j * dil + L, :]
                    .reshape(M, CP) for j in range(K)]
            if split_k:
                # v5e-friendly: K accumulated 128-deep MXU matmuls.
                acc = jnp.dot(taps[0], w_ref[0:CP, :],
                              preferred_element_type=jnp.float32)
                for j in range(1, K):
                    acc = acc + jnp.dot(taps[j], w_ref[j * CP:(j + 1) * CP, :],
                                        preferred_element_type=jnp.float32)
            else:
                # v6e/v7x: one wide K*128-deep contraction.
                xk = taps[0] if K == 1 else jnp.concatenate(taps, axis=-1)
                acc = jnp.dot(xk, w_ref[...],
                              preferred_element_type=jnp.float32)
            acc = acc + b_ref[...]                    # (1, CP) f32 bias
            if relu:
                acc = jnp.maximum(acc, 0.0)
            return acc

        h_c = None  # None => block input already resides in hpad (layer 0)
        for (dil, has_ds), brefs in zip(block_meta, blk_refs):
            if has_ds:
                w1_r, b1_r, w2_r, b2_r, wd_r, bd_r = brefs
            else:
                w1_r, b1_r, w2_r, b2_r = brefs

            if h_c is None:
                h_in_c = hpad_ref[:, OFF:OFF + L, :].reshape(M, CP)
            else:
                hpad_ref[:, OFF:OFF + L, :] = h_c.reshape(BB, L, CP)
                h_in_c = h_c

            # conv1 -> chomp -> relu   (dropout rate = 0 -> identity)
            o1 = conv_from_hpad(w1_r, b1_r, dil, relu=True)
            hpad_ref[:, OFF:OFF + L, :] = \
                o1.astype(compute_dtype).reshape(BB, L, CP)
            # conv2 -> chomp -> relu
            o2 = conv_from_hpad(w2_r, b2_r, dil, relu=True)

            # residual branch fused in the same kernel
            if has_ds:
                res = (jnp.dot(h_in_c, wd_r[...],
                               preferred_element_type=jnp.float32)
                       + bd_r[...])
            else:
                res = h_in_c.astype(jnp.float32)
            h_c = jnp.maximum(o2 + res, 0.0).astype(compute_dtype)

        # final Linear(num_channels[-1] -> output_size), lane-dense padded out
        y = (jnp.dot(h_c, wl_ref[...], preferred_element_type=jnp.float32)
             + bl_ref[...])
        out_ref[...] = y.reshape(BB, L, CP).astype(out_ref.dtype)

    return kernel


# ----------------------------------------------------------------------------
# Wrapper: parameter packing (weight-norm already folded), BB / VMEM sizing,
# pallas_call setup.
# ----------------------------------------------------------------------------
def dialted_cnn_forward(params, x, kernel_size, channel_last=True,
                        compute_dtype=jnp.bfloat16, out_dtype=None,
                        batch_block=None, split_k=None,
                        vmem_limit_bytes=None, slice_output=True):
    """x: (B, L, input_size) if channel_last else (B, input_size, L)."""
    if not channel_last:
        x = jnp.transpose(x, (0, 2, 1))
    B, L, Cin = x.shape
    K = kernel_size
    n_layers = len(params['blocks'])
    CP = LANE
    O = params['wl'].shape[0]
    C = params['wl'].shape[1]
    assert Cin <= CP and O <= CP and C <= CP, "channel dims must be <= 128"

    if out_dtype is None:
        out_dtype = jnp.float32

    # ---- light generation-specific defaults ---------------------------------
    kind = ""
    try:
        kind = jax.devices()[0].device_kind.lower()
    except Exception:
        pass
    if split_k is None:
        split_k = "v5" in kind                    # 128-wide MXU -> split-K
    if vmem_limit_bytes is None:
        if ("v5" in kind) or ("v6" in kind):      # 128 MiB physical VMEM
            vmem_limit_bytes = 100 * 1024 * 1024
        else:                                     # v7x: 64 MiB physical
            vmem_limit_bytes = 48 * 1024 * 1024

    # ---- weight packing (weight_norm already folded) ------------------------
    def pad_last(a, size):
        return jnp.pad(a, [(0, 0)] * (a.ndim - 1) + [(0, size - a.shape[-1])])

    def conv_w(w):  # (Cout, Cin, K) -> (K*CP, CP), rows ordered (tap, cin)
        wt = jnp.transpose(w, (2, 1, 0))  # (K, Cin, Cout)
        wt = jnp.pad(wt, ((0, 0), (0, CP - wt.shape[1]), (0, CP - wt.shape[2])))
        return wt.reshape(K * CP, CP).astype(compute_dtype)

    def vec(b):  # (Cc,) -> (1, CP) f32 bias (added to the f32 accumulator)
        return pad_last(b.astype(jnp.float32), CP).reshape(1, CP)

    flat_args = []
    block_meta = []
    for i, blk in enumerate(params['blocks']):
        dil = 2 ** i
        has_ds = 'wd' in blk
        block_meta.append((dil, has_ds))
        flat_args += [conv_w(blk['w1']), vec(blk['b1']),
                      conv_w(blk['w2']), vec(blk['b2'])]
        if has_ds:
            wd = jnp.transpose(blk['wd'][:, :, 0])  # (Cin, Cout)
            wd = jnp.pad(wd, ((0, CP - wd.shape[0]), (0, CP - wd.shape[1])))
            flat_args += [wd.astype(compute_dtype), vec(blk['bd'])]
    wl = jnp.transpose(params['wl'])  # (C, O)
    wl = jnp.pad(wl, ((0, CP - wl.shape[0]), (0, CP - wl.shape[1])))
    flat_args += [wl.astype(compute_dtype), vec(params['bl'])]

    # ---- halo-scratch geometry ----------------------------------------------
    fronts, backs = [0], [0]
    for i in range(n_layers):
        d = 2 ** i
        p = (K - 1) * d
        front = p if (p % 2 != 0) else p // 2
        fronts.append(front)
        backs.append(p - front)
    sub = 16 if compute_dtype == jnp.bfloat16 else 8
    OFF = _round_up(max(fronts), sub)          # aligned store offset
    LT = _round_up(OFF + L + max(backs), sub)

    # ---- batch tile: fill the MXU M dimension -------------------------------
    if batch_block is None:
        BB = max(1, min(B, -(-TARGET_M_ROWS // L)))
    else:
        BB = max(1, min(B, batch_block))

    def _vmem_estimate(bb):
        m = bb * L
        act = m * CP * 4 * (K + 8)                       # live f32 intermediates
        hp = bb * LT * CP * jnp.dtype(compute_dtype).itemsize
        io = 2 * bb * L * Cin * x.dtype.itemsize \
            + 2 * bb * L * CP * jnp.dtype(out_dtype).itemsize
        w = sum(int(a.size) * a.dtype.itemsize for a in flat_args)
        return act + hp + io + w

    while BB > 1 and _vmem_estimate(BB) > 0.6 * vmem_limit_bytes:
        BB = (BB + 1) // 2

    Bp = _round_up(B, BB)
    if Bp != B:
        x = jnp.pad(x, ((0, Bp - B), (0, 0), (0, 0)))    # batch remainder
    grid = (Bp // BB,)

    kernel = _make_fused_kernel(tuple(block_meta), K, BB, L, Cin, CP, OFF, LT,
                                compute_dtype, split_k)

    in_specs = [pl.BlockSpec((BB, L, Cin), lambda b: (b, 0, 0))]
    in_specs += [_weight_spec(a) for a in flat_args]

    out = pl.pallas_call(
        kernel,
        grid=grid,
        in_specs=in_specs,
        out_specs=pl.BlockSpec((BB, L, CP), lambda b: (b, 0, 0)),
        out_shape=jax.ShapeDtypeStruct((Bp, L, CP), out_dtype),
        scratch_shapes=[pltpu.VMEM((BB, LT, CP), compute_dtype)],
        compiler_params=pltpu.CompilerParams(
            dimension_semantics=("parallel",),   # v7x: 2 TCs split the batch
            vmem_limit_bytes=vmem_limit_bytes),
    )(x, *flat_args)

    if Bp != B:
        out = out[:B]
    if slice_output:
        out = out[:, :, :O]
    return out


# ----------------------------------------------------------------------------
# Parameter setup (weight_norm dim=0: w = g * v / ||v||; init uses g = ||v||).
# ----------------------------------------------------------------------------
def weight_norm_w(v, g):
    norm = jnp.sqrt(jnp.sum(v * v, axis=(1, 2), keepdims=True))
    return g.reshape(-1, 1, 1) * v / norm


def init_params(key, input_size, output_size, n_layers, n_channel, kernel_size):
    num_channels = [n_channel] * n_layers
    blocks = []
    for i in range(n_layers):
        cin = input_size if i == 0 else num_channels[i - 1]
        cout = num_channels[i]
        key, k1, k2, k3, k4, k5, k6 = jax.random.split(key, 7)
        v1 = 0.01 * jax.random.normal(k1, (cout, cin, kernel_size), jnp.float32)
        b1 = 0.01 * jax.random.normal(k2, (cout,), jnp.float32)
        v2 = 0.01 * jax.random.normal(k3, (cout, cout, kernel_size), jnp.float32)
        b2 = 0.01 * jax.random.normal(k4, (cout,), jnp.float32)
        g1 = jnp.sqrt(jnp.sum(v1 * v1, axis=(1, 2)))
        g2 = jnp.sqrt(jnp.sum(v2 * v2, axis=(1, 2)))
        block = {'w1': weight_norm_w(v1, g1), 'b1': b1,
                 'w2': weight_norm_w(v2, g2), 'b2': b2}
        if cin != cout:  # downsample 1x1 conv
            block['wd'] = 0.01 * jax.random.normal(k5, (cout, cin, 1), jnp.float32)
            block['bd'] = 0.01 * jax.random.normal(k6, (cout,), jnp.float32)
        blocks.append(block)
    key, kl1, kl2 = jax.random.split(key, 3)
    return {
        'blocks': blocks,
        'wl': 0.01 * jax.random.normal(kl1, (output_size, n_channel), jnp.float32),
        'bl': 0.01 * jax.random.normal(kl2, (output_size,), jnp.float32),
    }


# ----------------------------------------------------------------------------
# Pure-JAX (lax.conv) reference matching the given PyTorch spec.
# ----------------------------------------------------------------------------
def _ref_conv1d(x_ncl, w_oik, b, dilation, padding):
    y = jax.lax.conv_general_dilated(
        x_ncl, w_oik, window_strides=(1,), padding=[(padding, padding)],
        rhs_dilation=(dilation,), dimension_numbers=('NCH', 'OIH', 'NCH'))
    return y + b.reshape(1, -1, 1)


def _ref_chomp(x, p):
    if p == 0:
        return x
    if p % 2 != 0:
        return x[:, :, :-p]
    return x[:, :, p // 2:x.shape[2] - p // 2]


def reference_forward(params, x, kernel_size, channel_last=True):
    h = jnp.transpose(x, (0, 2, 1)) if channel_last else x  # -> (B, C, L)
    for i, blk in enumerate(params['blocks']):
        d = 2 ** i
        p = (kernel_size - 1) * d
        out = jax.nn.relu(_ref_chomp(_ref_conv1d(h, blk['w1'], blk['b1'], d, p), p))
        out = jax.nn.relu(_ref_chomp(_ref_conv1d(out, blk['w2'], blk['b2'], d, p), p))
        res = h if 'wd' not in blk else _ref_conv1d(h, blk['wd'], blk['bd'], 1, 0)
        h = jax.nn.relu(out + res)
    y1 = jnp.transpose(h, (0, 2, 1))  # (B, L, C)
    return jnp.einsum('blc,oc->blo', y1, params['wl']) + params['bl']


if __name__ == "__main__":
    # Small config consistent with DialtedCNN(input_size, output_size, n_layers,
    # n_channel, kernel_size, dropout=0); input is (batch, seq_len, input_size).
    B, L = 2, 16
    input_size, output_size = 4, 3
    n_layers, n_channel, kernel_size = 2, 32, 2

    key = jax.random.PRNGKey(0)
    key, kp, kx = jax.random.split(key, 3)
    params = init_params(kp, input_size, output_size, n_layers, n_channel,
                         kernel_size)
    x = jax.random.normal(kx, (B, L, input_size), jnp.float32)
    ref = jax.block_until_ready(reference_forward(params, x, kernel_size))

    # f32 path (exact): wide-contraction form.
    fwd_f32 = jax.jit(lambda p, xx: dialted_cnn_forward(
        p, xx, kernel_size, compute_dtype=jnp.float32, out_dtype=jnp.float32))
    out = jax.block_until_ready(fwd_f32(params, x))
    assert out.shape == (B, L, output_size), out.shape
    assert jnp.allclose(out, ref, atol=1e-5, rtol=1e-5), \
        f"f32 max abs err {jnp.max(jnp.abs(out - ref))}"

    # Default bf16 MXU-operand / f32-accumulate path, bf16 output writeback.
    fwd_bf16 = jax.jit(lambda p, xx: dialted_cnn_forward(
        p, xx, kernel_size, out_dtype=jnp.bfloat16))
    out_bf16 = jax.block_until_ready(fwd_bf16(params, x)).astype(jnp.float32)
    assert jnp.allclose(out_bf16, ref, atol=5e-3, rtol=5e-2), \
        f"bf16 max abs err {jnp.max(jnp.abs(out_bf16 - ref))}"

    # Batch-remainder (cdiv grid + padding) and split-K conv form (v5e path),
    # exercised explicitly regardless of chip generation.
    B2 = 3
    key, kx2 = jax.random.split(key)
    x2 = jax.random.normal(kx2, (B2, L, input_size), jnp.float32)
    ref2 = jax.block_until_ready(reference_forward(params, x2, kernel_size))
    fwd_rem = jax.jit(lambda p, xx: dialted_cnn_forward(
        p, xx, kernel_size, compute_dtype=jnp.float32, out_dtype=jnp.float32,
        batch_block=2, split_k=True))
    out2 = jax.block_until_ready(fwd_rem(params, x2))
    assert out2.shape == (B2, L, output_size), out2.shape
    assert jnp.allclose(out2, ref2, atol=1e-5, rtol=1e-5), \
        f"split-K/remainder max abs err {jnp.max(jnp.abs(out2 - ref2))}"

    print("KERNEL_OK")
</pallas_src>

<mosaic_0001>
module attributes {stable_mosaic.version = 11 : i64} {
  func.func @kernel(%arg0: i32, %arg1: memref<2x16x4xf32, #tpu.memory_space<vmem>>, %arg2: memref<256x128xf32, #tpu.memory_space<vmem>>, %arg3: memref<1x128xf32, #tpu.memory_space<vmem>>, %arg4: memref<256x128xf32, #tpu.memory_space<vmem>>, %arg5: memref<1x128xf32, #tpu.memory_space<vmem>>, %arg6: memref<128x128xf32, #tpu.memory_space<vmem>>, %arg7: memref<1x128xf32, #tpu.memory_space<vmem>>, %arg8: memref<256x128xf32, #tpu.memory_space<vmem>>, %arg9: memref<1x128xf32, #tpu.memory_space<vmem>>, %arg10: memref<256x128xf32, #tpu.memory_space<vmem>>, %arg11: memref<1x128xf32, #tpu.memory_space<vmem>>, %arg12: memref<128x128xf32, #tpu.memory_space<vmem>>, %arg13: memref<1x128xf32, #tpu.memory_space<vmem>>, %arg14: memref<2x16x128xf32, #tpu.memory_space<vmem>>, %arg15: memref<2x32x128xf32, #tpu.memory_space<vmem>>) attributes {dimension_semantics = [#tpu.dimension_semantics<parallel>], iteration_bounds = array<i64: 1>, scalar_prefetch = 0 : i64, scratch_operands = 1 : i64, tpu.core_type = #tpu.core_type<tc>, window_params = [{transform_indices = @transform_0, window_bounds = array<i64: 2, 16, 4>}, {pipeline_mode = #tpu.pipeline_mode<synchronous>, transform_indices = @transform_1, window_bounds = array<i64: 256, 128>}, {pipeline_mode = #tpu.pipeline_mode<synchronous>, transform_indices = @transform_2, window_bounds = array<i64: 1, 128>}, {pipeline_mode = #tpu.pipeline_mode<synchronous>, transform_indices = @transform_3, window_bounds = array<i64: 256, 128>}, {pipeline_mode = #tpu.pipeline_mode<synchronous>, transform_indices = @transform_4, window_bounds = array<i64: 1, 128>}, {pipeline_mode = #tpu.pipeline_mode<synchronous>, transform_indices = @transform_5, window_bounds = array<i64: 128, 128>}, {pipeline_mode = #tpu.pipeline_mode<synchronous>, transform_indices = @transform_6, window_bounds = array<i64: 1, 128>}, {pipeline_mode = #tpu.pipeline_mode<synchronous>, transform_indices = @transform_7, window_bounds = array<i64: 256, 128>}, {pipeline_mode = #tpu.pipeline_mode<synchronous>, transform_indices = @transform_8, window_bounds = array<i64: 1, 128>}, {pipeline_mode = #tpu.pipeline_mode<synchronous>, transform_indices = @transform_9, window_bounds = array<i64: 256, 128>}, {pipeline_mode = #tpu.pipeline_mode<synchronous>, transform_indices = @transform_10, window_bounds = array<i64: 1, 128>}, {pipeline_mode = #tpu.pipeline_mode<synchronous>, transform_indices = @transform_11, window_bounds = array<i64: 128, 128>}, {pipeline_mode = #tpu.pipeline_mode<synchronous>, transform_indices = @transform_12, window_bounds = array<i64: 1, 128>}, {transform_indices = @transform_13, window_bounds = array<i64: 2, 16, 128>}]} {
    %cst = arith.constant 0.000000e+00 : f32
    %0 = vector.broadcast %cst : f32 to vector<2x32x128xf32>
    %c0 = arith.constant 0 : index
    %c0_0 = arith.constant 0 : index
    %c0_1 = arith.constant 0 : index
    %1 = vector.load %arg15[%c0, %c0_0, %c0_1] : memref<2x32x128xf32, #tpu.memory_space<vmem>>, vector<2x32x128xf32>
    tpu.vector_store %arg15[%c0, %c0_0, %c0_1], %0 {strides = array<i32>} : memref<2x32x128xf32, #tpu.memory_space<vmem>>, vector<2x32x128xf32>,
    %c0_2 = arith.constant 0 : index
    %c0_3 = arith.constant 0 : index
    %c0_4 = arith.constant 0 : index
    %2 = vector.load %arg1[%c0_2, %c0_3, %c0_4] : memref<2x16x4xf32, #tpu.memory_space<vmem>>, vector<2x16x4xf32>
    %c0_5 = arith.constant 0 : index
    %c8 = arith.constant 8 : index
    %c0_6 = arith.constant 0 : index
    %3 = vector.load %arg15[%c0_5, %c8, %c0_6] : memref<2x32x128xf32, #tpu.memory_space<vmem>>, vector<2x16x4xf32>
    tpu.vector_store %arg15[%c0_5, %c8, %c0_6], %2 {strides = array<i32>} : memref<2x32x128xf32, #tpu.memory_space<vmem>>, vector<2x16x4xf32>,
    %c0_7 = arith.constant 0 : index
    %c8_8 = arith.constant 8 : index
    %c0_9 = arith.constant 0 : index
    %4 = vector.load %arg15[%c0_7, %c8_8, %c0_9] : memref<2x32x128xf32, #tpu.memory_space<vmem>>, vector<2x16x128xf32>
    %5 = vector.shape_cast %4 : vector<2x16x128xf32> to vector<32x128xf32>
    %c0_10 = arith.constant 0 : index
    %c7 = arith.constant 7 : index
    %c0_11 = arith.constant 0 : index
    %6 = vector.load %arg15[%c0_10, %c7, %c0_11] : memref<2x32x128xf32, #tpu.memory_space<vmem>>, vector<2x16x128xf32>
    %7 = vector.shape_cast %6 : vector<2x16x128xf32> to vector<32x128xf32>
    %c0_12 = arith.constant 0 : index
    %c8_13 = arith.constant 8 : index
    %c0_14 = arith.constant 0 : index
    %8 = vector.load %arg15[%c0_12, %c8_13, %c0_14] : memref<2x32x128xf32, #tpu.memory_space<vmem>>, vector<2x16x128xf32>
    %9 = vector.shape_cast %8 : vector<2x16x128xf32> to vector<32x128xf32>
    %10 = tpu.concatenate %7, %9 in 1 : vector<32x128xf32>, vector<32x128xf32> -> vector<32x256xf32>
    %c0_15 = arith.constant 0 : index
    %c0_16 = arith.constant 0 : index
    %11 = vector.load %arg2[%c0_15, %c0_16] : memref<256x128xf32, #tpu.memory_space<vmem>>, vector<256x128xf32>
    %cst_17 = arith.constant dense<0.000000e+00> : vector<32x128xf32>
    %12 = tpu.matmul %10, %11, %cst_17 {dimension_numbers = #tpu.dot_dimension_numbers<[1], [0], [0], [1], [0, 0, 1, 1], [], []>} : vector<32x256xf32>, vector<256x128xf32>, vector<32x128xf32> -> vector<32x128xf32>
    %c0_18 = arith.constant 0 : index
    %c0_19 = arith.constant 0 : index
    %13 = vector.load %arg3[%c0_18, %c0_19] : memref<1x128xf32, #tpu.memory_space<vmem>>, vector<1x128xf32>
    %14 = vector.broadcast %13 : vector<1x128xf32> to vector<32x128xf32>
    %15 = arith.addf %12, %14 : vector<32x128xf32>
    %cst_20 = arith.constant 0.000000e+00 : f32
    %16 = vector.broadcast %cst_20 : f32 to vector<32x128xf32>
    %17 = arith.maximumf %15, %16 : vector<32x128xf32>
    %18 = vector.shape_cast %17 : vector<32x128xf32> to vector<2x16x128xf32>
    %c0_21 = arith.constant 0 : index
    %c8_22 = arith.constant 8 : index
    %c0_23 = arith.constant 0 : index
    %19 = vector.load %arg15[%c0_21, %c8_22, %c0_23] : memref<2x32x128xf32, #tpu.memory_space<vmem>>, vector<2x16x128xf32>
    tpu.vector_store %arg15[%c0_21, %c8_22, %c0_23], %18 {strides = array<i32>} : memref<2x32x128xf32, #tpu.memory_space<vmem>>, vector<2x16x128xf32>,
    %c0_24 = arith.constant 0 : index
    %c7_25 = arith.constant 7 : index
    %c0_26 = arith.constant 0 : index
    %20 = vector.load %arg15[%c0_24, %c7_25, %c0_26] : memref<2x32x128xf32, #tpu.memory_space<vmem>>, vector<2x16x128xf32>
    %21 = vector.shape_cast %20 : vector<2x16x128xf32> to vector<32x128xf32>
    %c0_27 = arith.constant 0 : index
    %c8_28 = arith.constant 8 : index
    %c0_29 = arith.constant 0 : index
    %22 = vector.load %arg15[%c0_27, %c8_28, %c0_29] : memref<2x32x128xf32, #tpu.memory_space<vmem>>, vector<2x16x128xf32>
    %23 = vector.shape_cast %22 : vector<2x16x128xf32> to vector<32x128xf32>
    %24 = tpu.concatenate %21, %23 in 1 : vector<32x128xf32>, vector<32x128xf32> -> vector<32x256xf32>
    %c0_30 = arith.constant 0 : index
    %c0_31 = arith.constant 0 : index
    %25 = vector.load %arg4[%c0_30, %c0_31] : memref<256x128xf32, #tpu.memory_space<vmem>>, vector<256x128xf32>
    %cst_32 = arith.constant dense<0.000000e+00> : vector<32x128xf32>
    %26 = tpu.matmul %24, %25, %cst_32 {dimension_numbers = #tpu.dot_dimension_numbers<[1], [0], [0], [1], [0, 0, 1, 1], [], []>} : vector<32x256xf32>, vector<256x128xf32>, vector<32x128xf32> -> vector<32x128xf32>
    %c0_33 = arith.constant 0 : index
    %c0_34 = arith.constant 0 : index
    %27 = vector.load %arg5[%c0_33, %c0_34] : memref<1x128xf32, #tpu.memory_space<vmem>>, vector<1x128xf32>
    %28 = vector.broadcast %27 : vector<1x128xf32> to vector<32x128xf32>
    %29 = arith.addf %26, %28 : vector<32x128xf32>
    %cst_35 = arith.constant 0.000000e+00 : f32
    %30 = vector.broadcast %cst_35 : f32 to vector<32x128xf32>
    %31 = arith.maximumf %29, %30 : vector<32x128xf32>
    %c0_36 = arith.constant 0 : index
    %c0_37 = arith.constant 0 : index
    %32 = vector.load %arg6[%c0_36, %c0_37] : memref<128x128xf32, #tpu.memory_space<vmem>>, vector<128x128xf32>
    %cst_38 = arith.constant dense<0.000000e+00> : vector<32x128xf32>
    %33 = tpu.matmul %5, %32, %cst_38 {dimension_numbers = #tpu.dot_dimension_numbers<[1], [0], [0], [1], [0, 0, 1, 1], [], []>} : vector<32x128xf32>, vector<128x128xf32>, vector<32x128xf32> -> vector<32x128xf32>
    %c0_39 = arith.constant 0 : index
    %c0_40 = arith.constant 0 : index
    %34 = vector.load %arg7[%c0_39, %c0_40] : memref<1x128xf32, #tpu.memory_space<vmem>>, vector<1x128xf32>
    %35 = vector.broadcast %34 : vector<1x128xf32> to vector<32x128xf32>
    %36 = arith.addf %33, %35 : vector<32x128xf32>
    %37 = arith.addf %31, %36 : vector<32x128xf32>
    %cst_41 = arith.constant 0.000000e+00 : f32
    %38 = vector.broadcast %cst_41 : f32 to vector<32x128xf32>
    %39 = arith.maximumf %37, %38 : vector<32x128xf32>
    %40 = vector.shape_cast %39 : vector<32x128xf32> to vector<2x16x128xf32>
    %c0_42 = arith.constant 0 : index
    %c8_43 = arith.constant 8 : index
    %c0_44 = arith.constant 0 : index
    %41 = vector.load %arg15[%c0_42, %c8_43, %c0_44] : memref<2x32x128xf32, #tpu.memory_space<vmem>>, vector<2x16x128xf32>
    tpu.vector_store %arg15[%c0_42, %c8_43, %c0_44], %40 {strides = array<i32>} : memref<2x32x128xf32, #tpu.memory_space<vmem>>, vector<2x16x128xf32>,
    %c0_45 = arith.constant 0 : index
    %c7_46 = arith.constant 7 : index
    %c0_47 = arith.constant 0 : index
    %42 = vector.load %arg15[%c0_45, %c7_46, %c0_47] : memref<2x32x128xf32, #tpu.memory_space<vmem>>, vector<2x16x128xf32>
    %43 = vector.shape_cast %42 : vector<2x16x128xf32> to vector<32x128xf32>
    %c0_48 = arith.constant 0 : index
    %c9 = arith.constant 9 : index
    %c0_49 = arith.constant 0 : index
    %44 = vector.load %arg15[%c0_48, %c9, %c0_49] : memref<2x32x128xf32, #tpu.memory_space<vmem>>, vector<2x16x128xf32>
    %45 = vector.shape_cast %44 : vector<2x16x128xf32> to vector<32x128xf32>
    %46 = tpu.concatenate %43, %45 in 1 : vector<32x128xf32>, vector<32x128xf32> -> vector<32x256xf32>
    %c0_50 = arith.constant 0 : index
    %c0_51 = arith.constant 0 : index
    %47 = vector.load %arg8[%c0_50, %c0_51] : memref<256x128xf32, #tpu.memory_space<vmem>>, vector<256x128xf32>
    %cst_52 = arith.constant dense<0.000000e+00> : vector<32x128xf32>
    %48 = tpu.matmul %46, %47, %cst_52 {dimension_numbers = #tpu.dot_dimension_numbers<[1], [0], [0], [1], [0, 0, 1, 1], [], []>} : vector<32x256xf32>, vector<256x128xf32>, vector<32x128xf32> -> vector<32x128xf32>
    %c0_53 = arith.constant 0 : index
    %c0_54 = arith.constant 0 : index
    %49 = vector.load %arg9[%c0_53, %c0_54] : memref<1x128xf32, #tpu.memory_space<vmem>>, vector<1x128xf32>
    %50 = vector.broadcast %49 : vector<1x128xf32> to vector<32x128xf32>
    %51 = arith.addf %48, %50 : vector<32x128xf32>
    %cst_55 = arith.constant 0.000000e+00 : f32
    %52 = vector.broadcast %cst_55 : f32 to vector<32x128xf32>
    %53 = arith.maximumf %51, %52 : vector<32x128xf32>
    %54 = vector.shape_cast %53 : vector<32x128xf32> to vector<2x16x128xf32>
    %c0_56 = arith.constant 0 : index
    %c8_57 = arith.constant 8 : index
    %c0_58 = arith.constant 0 : index
    %55 = vector.load %arg15[%c0_56, %c8_57, %c0_58] : memref<2x32x128xf32, #tpu.memory_space<vmem>>, vector<2x16x128xf32>
    tpu.vector_store %arg15[%c0_56, %c8_57, %c0_58], %54 {strides = array<i32>} : memref<2x32x128xf32, #tpu.memory_space<vmem>>, vector<2x16x128xf32>,
    %c0_59 = arith.constant 0 : index
    %c7_60 = arith.constant 7 : index
    %c0_61 = arith.constant 0 : index
    %56 = vector.load %arg15[%c0_59, %c7_60, %c0_61] : memref<2x32x128xf32, #tpu.memory_space<vmem>>, vector<2x16x128xf32>
    %57 = vector.shape_cast %56 : vector<2x16x128xf32> to vector<32x128xf32>
    %c0_62 = arith.constant 0 : index
    %c9_63 = arith.constant 9 : index
    %c0_64 = arith.constant 0 : index
    %58 = vector.load %arg15[%c0_62, %c9_63, %c0_64] : memref<2x32x128xf32, #tpu.memory_space<vmem>>, vector<2x16x128xf32>
    %59 = vector.shape_cast %58 : vector<2x16x128xf32> to vector<32x128xf32>
    %60 = tpu.concatenate %57, %59 in 1 : vector<32x128xf32>, vector<32x128xf32> -> vector<32x256xf32>
    %c0_65 = arith.constant 0 : index
    %c0_66 = arith.constant 0 : index
    %61 = vector.load %arg10[%c0_65, %c0_66] : memref<256x128xf32, #tpu.memory_space<vmem>>, vector<256x128xf32>
    %cst_67 = arith.constant dense<0.000000e+00> : vector<32x128xf32>
    %62 = tpu.matmul %60, %61, %cst_67 {dimension_numbers = #tpu.dot_dimension_numbers<[1], [0], [0], [1], [0, 0, 1, 1], [], []>} : vector<32x256xf32>, vector<256x128xf32>, vector<32x128xf32> -> vector<32x128xf32>
    %c0_68 = arith.constant 0 : index
    %c0_69 = arith.constant 0 : index
    %63 = vector.load %arg11[%c0_68, %c0_69] : memref<1x128xf32, #tpu.memory_space<vmem>>, vector<1x128xf32>
    %64 = vector.broadcast %63 : vector<1x128xf32> to vector<32x128xf32>
    %65 = arith.addf %62, %64 : vector<32x128xf32>
    %cst_70 = arith.constant 0.000000e+00 : f32
    %66 = vector.broadcast %cst_70 : f32 to vector<32x128xf32>
    %67 = arith.maximumf %65, %66 : vector<32x128xf32>
    %68 = arith.addf %67, %39 : vector<32x128xf32>
    %cst_71 = arith.constant 0.000000e+00 : f32
    %69 = vector.broadcast %cst_71 : f32 to vector<32x128xf32>
    %70 = arith.maximumf %68, %69 : vector<32x128xf32>
    %c0_72 = arith.constant 0 : index
    %c0_73 = arith.constant 0 : index
    %71 = vector.load %arg12[%c0_72, %c0_73] : memref<128x128xf32, #tpu.memory_space<vmem>>, vector<128x128xf32>
    %cst_74 = arith.constant dense<0.000000e+00> : vector<32x128xf32>
    %72 = tpu.matmul %70, %71, %cst_74 {dimension_numbers = #tpu.dot_dimension_numbers<[1], [0], [0], [1], [0, 0, 1, 1], [], []>} : vector<32x128xf32>, vector<128x128xf32>, vector<32x128xf32> -> vector<32x128xf32>
    %c0_75 = arith.constant 0 : index
    %c0_76 = arith.constant 0 : index
    %73 = vector.load %arg13[%c0_75, %c0_76] : memref<1x128xf32, #tpu.memory_space<vmem>>, vector<1x128xf32>
    %74 = vector.broadcast %73 : vector<1x128xf32> to vector<32x128xf32>
    %75 = arith.addf %72, %74 : vector<32x128xf32>
    %76 = vector.shape_cast %75 : vector<32x128xf32> to vector<2x16x128xf32>
    %c0_77 = arith.constant 0 : index
    %c0_78 = arith.constant 0 : index
    %c0_79 = arith.constant 0 : index
    %77 = vector.load %arg14[%c0_77, %c0_78, %c0_79] : memref<2x16x128xf32, #tpu.memory_space<vmem>>, vector<2x16x128xf32>
    tpu.vector_store %arg14[%c0_77, %c0_78, %c0_79], %76 {strides = array<i32>} : memref<2x16x128xf32, #tpu.memory_space<vmem>>, vector<2x16x128xf32>,
    return
  }
  func.func @transform_0(%arg0: i32) -> (i32, i32, i32) {
    %c0_i32 = arith.constant 0 : i32
    %c0_i32_0 = arith.constant 0 : i32
    %c0_i32_1 = arith.constant 0 : i32
    return %arg0, %c0_i32, %c0_i32_0 : i32, i32, i32
  }
  func.func @transform_1(%arg0: i32) -> (i32, i32) {
    %c0_i32 = arith.constant 0 : i32
    %c0_i32_0 = arith.constant 0 : i32
    %c0_i32_1 = arith.constant 0 : i32
    return %c0_i32, %c0_i32_0 : i32, i32
  }
  func.func @transform_2(%arg0: i32) -> (i32, i32) {
    %c0_i32 = arith.constant 0 : i32
    %c0_i32_0 = arith.constant 0 : i32
    %c0_i32_1 = arith.constant 0 : i32
    return %c0_i32, %c0_i32_0 : i32, i32
  }
  func.func @transform_3(%arg0: i32) -> (i32, i32) {
    %c0_i32 = arith.constant 0 : i32
    %c0_i32_0 = arith.constant 0 : i32
    %c0_i32_1 = arith.constant 0 : i32
    return %c0_i32, %c0_i32_0 : i32, i32
  }
  func.func @transform_4(%arg0: i32) -> (i32, i32) {
    %c0_i32 = arith.constant 0 : i32
    %c0_i32_0 = arith.constant 0 : i32
    %c0_i32_1 = arith.constant 0 : i32
    return %c0_i32, %c0_i32_0 : i32, i32
  }
  func.func @transform_5(%arg0: i32) -> (i32, i32) {
    %c0_i32 = arith.constant 0 : i32
    %c0_i32_0 = arith.constant 0 : i32
    %c0_i32_1 = arith.constant 0 : i32
    return %c0_i32, %c0_i32_0 : i32, i32
  }
  func.func @transform_6(%arg0: i32) -> (i32, i32) {
    %c0_i32 = arith.constant 0 : i32
    %c0_i32_0 = arith.constant 0 : i32
    %c0_i32_1 = arith.constant 0 : i32
    return %c0_i32, %c0_i32_0 : i32, i32
  }
  func.func @transform_7(%arg0: i32) -> (i32, i32) {
    %c0_i32 = arith.constant 0 : i32
    %c0_i32_0 = arith.constant 0 : i32
    %c0_i32_1 = arith.constant 0 : i32
    return %c0_i32, %c0_i32_0 : i32, i32
  }
  func.func @transform_8(%arg0: i32) -> (i32, i32) {
    %c0_i32 = arith.constant 0 : i32
    %c0_i32_0 = arith.constant 0 : i32
    %c0_i32_1 = arith.constant 0 : i32
    return %c0_i32, %c0_i32_0 : i32, i32
  }
  func.func @transform_9(%arg0: i32) -> (i32, i32) {
    %c0_i32 = arith.constant 0 : i32
    %c0_i32_0 = arith.constant 0 : i32
    %c0_i32_1 = arith.constant 0 : i32
    return %c0_i32, %c0_i32_0 : i32, i32
  }
  func.func @transform_10(%arg0: i32) -> (i32, i32) {
    %c0_i32 = arith.constant 0 : i32
    %c0_i32_0 = arith.constant 0 : i32
    %c0_i32_1 = arith.constant 0 : i32
    return %c0_i32, %c0_i32_0 : i32, i32
  }
  func.func @transform_11(%arg0: i32) -> (i32, i32) {
    %c0_i32 = arith.constant 0 : i32
    %c0_i32_0 = arith.constant 0 : i32
    %c0_i32_1 = arith.constant 0 : i32
    return %c0_i32, %c0_i32_0 : i32, i32
  }
  func.func @transform_12(%arg0: i32) -> (i32, i32) {
    %c0_i32 = arith.constant 0 : i32
    %c0_i32_0 = arith.constant 0 : i32
    %c0_i32_1 = arith.constant 0 : i32
    return %c0_i32, %c0_i32_0 : i32, i32
  }
  func.func @transform_13(%arg0: i32) -> (i32, i32, i32) {
    %c0_i32 = arith.constant 0 : i32
    %c0_i32_0 = arith.constant 0 : i32
    %c0_i32_1 = arith.constant 0 : i32
    return %arg0, %c0_i32, %c0_i32_0 : i32, i32, i32
  }
}

</mosaic_0001>

<bundles_post_ra>
// kernel: _lambda_.1
= control target key start
LH: loop header
LB: loop body
LE: loop exit
PB: predicated region body
PF: predicated region fallthrough
CT: control target
= control target key end

     0   :  { %v1348_v3 = vmov 0.0   ;;  %vm56_vm0 = vcmask 31744   ;;  %s1997_s1 = inlined_call_operand.vmem [shape: f32[256,128], index: 1, kind: input, shape index: {}]   ;;  %s1998_s0 = inlined_call_operand.vmem [shape: f32[2,16,4], index: 0, kind: input, shape index: {}]   ;;  %s1999_s3 = inlined_call_operand.vmem [shape: f32[256,128], index: 3, kind: input, shape index: {}]   ;;  %s2000_s5 = inlined_call_operand.vmem [shape: f32[128,128], index: 5, kind: input, shape index: {}]   ;;  %s2001_s7 = inlined_call_operand.vmem [shape: f32[256,128], index: 7, kind: input, shape index: {}]   ;;  %s2002_s2 = inlined_call_operand.vmem [shape: f32[1,128], index: 2, kind: input, shape index: {}]   ;;  %s2003_s9 = inlined_call_operand.vmem [shape: f32[256,128], index: 9, kind: input, shape index: {}]   ;;  %s2004_s4 = inlined_call_operand.vmem [shape: f32[1,128], index: 4, kind: input, shape index: {}]   ;;  %s2005_s6 = inlined_call_operand.vmem [shape: f32[1,128], index: 6, kind: input, shape index: {}]   ;;  %s2006_s11 = inlined_call_operand.vmem [shape: f32[128,128], index: 11, kind: input, shape index: {}]   ;;  %s2007_s8 = inlined_call_operand.vmem [shape: f32[1,128], index: 8, kind: input, shape index: {}]   ;;  %s2008_s10 = inlined_call_operand.vmem [shape: f32[1,128], index: 10, kind: input, shape index: {}]   ;;  %s2009_s12 = inlined_call_operand.vmem [shape: f32[1,128], index: 12, kind: input, shape index: {}]   ;;  %s2010_s13 = inlined_call_operand.vmem [shape: f32[2,16,128], index: 13, kind: output, shape index: {}]  }
   0x1   :  { %v85_v0 = vld [vmem:[%s1997_s1 + $0x80] sm:$0xff]  ;;  %v86_v1 = vld [vmem:[%s1997_s1 + $0x88] sm:$0xff]  ;;  %45 = vst [vmem:[#allocation2 + $0x8] sm:$0xff] %v1348_v3  ;;  %44 = vst [vmem:[#allocation2] sm:$0xff] %v1348_v3 }
   0x2   :  { %v69_v2 = vld [vmem:[%s1997_s1] sm:$0xff]  ;;  %46 = vst [vmem:[#allocation2 + $0x10] sm:$0xff] %v1348_v3  ;;  %47 = vst [vmem:[#allocation2 + $0x18] sm:$0xff] %v1348_v3  ;;  %v1155_v4 = vpack.c.bf16 %v86_v1, %v85_v0  ;;  %v70_v5 = vld [vmem:[%s1997_s1 + $0x8] sm:$0xff] }
   0x3   :  { %48 = vst [vmem:[#allocation2 + $0x20] sm:$0xff] %v1348_v3  ;;  %49 = vst [vmem:[#allocation2 + $0x28] sm:$0xff] %v1348_v3  ;;  %v87_v6 = vld [vmem:[%s1997_s1 + $0x90] sm:$0xff]  ;;  %v88_v7 = vld [vmem:[%s1997_s1 + $0x98] sm:$0xff]  ;;  %v1157_v8 = vpack.c.bf16 %v70_v5, %v69_v2 }
   0x4   :  { %50 = vst [vmem:[#allocation2 + $0x30] sm:$0xff] %v1348_v3  ;;  %51 = vst [vmem:[#allocation2 + $0x38] sm:$0xff] %v1348_v3  ;;  %v1159_v9 = vpack.c.bf16 %v88_v7, %v87_v6  ;;  %v71_v10 = vld [vmem:[%s1997_s1 + $0x10] sm:$0xff]  ;;  %v72_v11 = vld [vmem:[%s1997_s1 + $0x18] sm:$0xff]  ;;  %1156 = vmatprep.subr.bf16.mxu0 %v1155_v4 }
   0x5   :  { %v89_v12 = vld [vmem:[%s1997_s1 + $0xa0] sm:$0xff]  ;;  %v90_v13 = vld [vmem:[%s1997_s1 + $0xa8] sm:$0xff]  ;;  %1158 = vmatpush3.bf16.msra.mxu0 %v1157_v8  ;;  %v1161_v14 = vpack.c.bf16 %v72_v11, %v71_v10  ;;  %v91_v18 = vld [vmem:[%s1997_s1 + $0xb0] sm:$0xff] }
   0x6   :  { %1160 = vmatprep.subr.bf16.mxu0 %v1159_v9  ;;  %v1163_v15 = vpack.c.bf16 %v90_v13, %v89_v12  ;;  %v73_v16 = vld [vmem:[%s1997_s1 + $0x20] sm:$0xff]  ;;  %v74_v17 = vld [vmem:[%s1997_s1 + $0x28] sm:$0xff]  ;;  %v92_v19 = vld [vmem:[%s1997_s1 + $0xb8] sm:$0xff] }
   0x7   :  { %v1165_v20 = vpack.c.bf16 %v74_v17, %v73_v16  ;;  %v1167_v21 = vpack.c.bf16 %v92_v19, %v91_v18  ;;  %v75_v22 = vld [vmem:[%s1997_s1 + $0x30] sm:$0xff]  ;;  %v76_v23 = vld [vmem:[%s1997_s1 + $0x38] sm:$0xff]  ;;  %v93_v24 = vld [vmem:[%s1997_s1 + $0xc0] sm:$0xff] }
   0x8   :  { %v94_v25 = vld [vmem:[%s1997_s1 + $0xc8] sm:$0xff]  ;;  %v52_v26 = vld [vmem:[%s1998_s0] sm:$0xff]  ;;  %v54_v30 = vld [vmem:[%s1998_s0 + $0x10] sm:$0xff]  ;;  %v1169_v32 = vpack.c.bf16 %v76_v23, %v75_v22 }
   0x9   :  { %1162 = vmatpush3.bf16.msra.mxu0 %v1161_v14  ;;  %v77_v27 = vld [vmem:[%s1997_s1 + $0x40] sm:$0xff]  ;;  %v78_v28 = vld [vmem:[%s1997_s1 + $0x48] sm:$0xff]  ;;  %57 = vst.msk [vmem:[#allocation2 + $0x8] sm:$0xff] %vm56_vm0, %v52_v26  ;;  %v55_v31 = vld [vmem:[%s1998_s0 + $0x18] sm:$0xff]  ;;  %v1171_v36 = vpack.c.bf16 %v94_v25, %v93_v24 }
   0xa   :  { %1164 = vmatprep.subr.bf16.mxu0 %v1163_v15  ;;  %v53_v29 = vld [vmem:[%s1998_s0 + $0x8] sm:$0xff]  ;;  %59 = vst.msk [vmem:[#allocation2 + $0x28] sm:$0xff] %vm56_vm0, %v54_v30  ;;  %60 = vst.msk [vmem:[#allocation2 + $0x30] sm:$0xff] %vm56_vm0, %v55_v31  ;;  %v225_v33 = vld [vmem:[%s1999_s3 + $0x80] sm:$0xff]  ;;  %v1173_v49 = vpack.c.bf16 %v78_v28, %v77_v27 }
   0xb   :  { %58 = vst.msk [vmem:[#allocation2 + $0x10] sm:$0xff] %vm56_vm0, %v53_v29  ;;  %v226_v34 = vld [vmem:[%s1999_s3 + $0x88] sm:$0xff]  ;;  %v209_v35 = vld [vmem:[%s1999_s3] sm:$0xff]  ;;  %v227_v39 = vld [vmem:[%s1999_s3 + $0x90] sm:$0xff] }
   0xc   :  { %v1187_v37 = vpack.c.bf16 %v226_v34, %v225_v33  ;;  %v210_v38 = vld [vmem:[%s1999_s3 + $0x8] sm:$0xff]  ;;  %v228_v40 = vld [vmem:[%s1999_s3 + $0x98] sm:$0xff]  ;;  %v95_v41 = vld [vmem:[%s1997_s1 + $0xd0] sm:$0xff] }
   0xd   :  { %1166 = vmatpush3.bf16.msra.mxu0 %v1165_v20  ;;  %v96_v42 = vld [vmem:[%s1997_s1 + $0xd8] sm:$0xff]  ;;  %v1189_v43 = vpack.c.bf16 %v210_v38, %v209_v35  ;;  %v1191_v44 = vpack.c.bf16 %v228_v40, %v227_v39  ;;  %v211_v45 = vld [vmem:[%s1999_s3 + $0x10] sm:$0xff]  ;;  %v229_v47 = vld [vmem:[%s1999_s3 + $0xa0] sm:$0xff] }
   0xe   :  { %1168 = vmatprep.subr.bf16.mxu0 %v1167_v21  ;;  %1188 = vmatprep.subr.bf16.mxu1 %v1187_v37  ;;  %v212_v46 = vld [vmem:[%s1999_s3 + $0x18] sm:$0xff]  ;;  %v230_v48 = vld [vmem:[%s1999_s3 + $0xa8] sm:$0xff]  ;;  %v79_v50 = vld [vmem:[%s1997_s1 + $0x50] sm:$0xff]  ;;  %v1175_v54 = vpack.c.bf16 %v96_v42, %v95_v41 }
   0xf   :  { %v80_v51 = vld [vmem:[%s1997_s1 + $0x58] sm:$0xff]  ;;  %v97_v52 = vld [vmem:[%s1997_s1 + $0xe0] sm:$0xff]  ;;  %1190 = vmatpush3.bf16.msra.mxu1 %v1189_v43  ;;  %v1193_v53 = vpack.c.bf16 %v212_v46, %v211_v45  ;;  %v98_v55 = vld [vmem:[%s1997_s1 + $0xe8] sm:$0xff]  ;;  %v1195_v56 = vpack.c.bf16 %v230_v48, %v229_v47 }
  0x10   :  { %1192 = vmatprep.subr.bf16.mxu1 %v1191_v44  ;;  %v213_v57 = vld [vmem:[%s1999_s3 + $0x20] sm:$0xff]  ;;  %v214_v58 = vld [vmem:[%s1999_s3 + $0x28] sm:$0xff]  ;;  %v231_v60 = vld [vmem:[%s1999_s3 + $0xb0] sm:$0xff]  ;;  %v1177_v62 = vpack.c.bf16 %v80_v51, %v79_v50  ;;  %v1179_v1 = vpack.c.bf16 %v98_v55, %v97_v52 }
  0x11   :  { %1170 = vmatpush3.bf16.msra.mxu0 %v1169_v32  ;;  %v61_v59 = vld [vmem:[#allocation2 + $0x8] sm:$0xff]  ;;  %v232_v61 = vld [vmem:[%s1999_s3 + $0xb8] sm:$0xff]  ;;  %v81_v63 = vld [vmem:[%s1997_s1 + $0x60] sm:$0xff]  ;;  %v1197_v0 = vpack.c.bf16 %v214_v58, %v213_v57 }
  0x12   :  { %1172 = vmatprep.subr.bf16.mxu0 %v1171_v36  ;;  %172 = vmatprep.mubr.f32.mxu0 %v61_v59  ;;  %v82_v2 = vld [vmem:[%s1997_s1 + $0x68] sm:$0xff]  ;;  %v1199_v3 = vpack.c.bf16 %v232_v61, %v231_v60  ;;  %v215_v4 = vld [vmem:[%s1999_s3 + $0x30] sm:$0xff]  ;;  %v216_v5 = vld [vmem:[%s1999_s3 + $0x38] sm:$0xff] }
  0x13   :  { %1194 = vmatpush3.bf16.msra.mxu1 %v1193_v53  ;;  %v99_v6 = vld [vmem:[%s1997_s1 + $0xf0] sm:$0xff]  ;;  %v100_v7 = vld [vmem:[%s1997_s1 + $0xf8] sm:$0xff]  ;;  %v1181_v8 = vpack.c.bf16 %v82_v2, %v81_v63  ;;  %v1201_v9 = vpack.c.bf16 %v216_v5, %v215_v4  ;;  %v337_v13 = vld [vmem:[%s2000_s5] sm:$0xff] }
  0x14   :  { %1196 = vmatprep.subr.bf16.mxu1 %v1195_v56  ;;  %v1183_v10 = vpack.c.bf16 %v100_v7, %v99_v6  ;;  %v83_v11 = vld [vmem:[%s1997_s1 + $0x70] sm:$0xff]  ;;  %v84_v12 = vld [vmem:[%s1997_s1 + $0x78] sm:$0xff]  ;;  %v338_v14 = vld [vmem:[%s2000_s5 + $0x8] sm:$0xff] }
  0x15   :  { %1174 = vmatpush3.bf16.msra.mxu0 %v1173_v49  ;;  %v1185_v15 = vpack.c.bf16 %v84_v12, %v83_v11  ;;  %v1219_v16 = vpack.c.bf16 %v338_v14, %v337_v13  ;;  %v339_v17 = vld [vmem:[%s2000_s5 + $0x10] sm:$0xff]  ;;  %v340_v18 = vld [vmem:[%s2000_s5 + $0x18] sm:$0xff]  ;;  %v65_v19 = vld [vmem:[#allocation2 + $0x7] sm:$0xff] }
  0x16   :  { %1176 = vmatprep.subr.bf16.mxu0 %v1175_v54  ;;  %v1591_v20 = vld [vmem:[#allocation2 + $0x10] sm:$0xff]  ;;  %v1223_v21 = vpack.c.bf16 %v340_v18, %v339_v17  ;;  %v341_v22 = vld [vmem:[%s2000_s5 + $0x20] sm:$0xff]  ;;  %v342_v23 = vld [vmem:[%s2000_s5 + $0x28] sm:$0xff] }
  0x17   :  { %1198 = vmatpush3.bf16.msra.mxu1 %v1197_v0  ;;  %v66_v24 = vld [vmem:[#allocation2 + $0xf] sm:$0xff]  ;;  %v1227_v26 = vpack.c.bf16 %v342_v23, %v341_v22  ;;  %v67_v27 = vld [vmem:[#allocation2 + $0x27] sm:$0xff]  ;;  %v344_v34 = vld [vmem:[%s2000_s5 + $0x38] sm:$0xff] }
  0x18   :  { %1200 = vmatprep.subr.bf16.mxu1 %v1199_v3  ;;  %v1600_v25 = vld [vmem:[#allocation2 + $0x28] sm:$0xff]  ;;  %v1603_v28 = vld [vmem:[#allocation2 + $0x30] sm:$0xff]  ;;  %v233_v30 = vld [vmem:[%s1999_s3 + $0xc0] sm:$0xff] }
  0x19   :  { %1178 = vmatpush3.bf16.msra.mxu0 %v1177_v62  ;;  %v68_v29 = vld [vmem:[#allocation2 + $0x2f] sm:$0xff]  ;;  %v217_v35 = vld [vmem:[%s1999_s3 + $0x40] sm:$0xff]  ;;  %v236_v40 = vld [vmem:[%s1999_s3 + $0xd8] sm:$0xff] }
  0x1a   :  { %1180 = vmatprep.subr.bf16.mxu0 %v1179_v1  ;;  %v234_v31 = vld [vmem:[%s1999_s3 + $0xc8] sm:$0xff]  ;;  %v343_v32 = vld [vmem:[%s2000_s5 + $0x30] sm:$0xff]  ;;  %v345_v42 = vld [vmem:[%s2000_s5 + $0x40] sm:$0xff] }
  0x1b   :  { %1202 = vmatpush3.bf16.msra.mxu1 %v1201_v9  ;;  %v1203_v33 = vpack.c.bf16 %v234_v31, %v233_v30  ;;  %v218_v36 = vld [vmem:[%s1999_s3 + $0x48] sm:$0xff]  ;;  %v1231_v37 = vpack.c.bf16 %v344_v34, %v343_v32  ;;  %v235_v39 = vld [vmem:[%s1999_s3 + $0xd0] sm:$0xff]  ;;  %v220_v46 = vld [vmem:[%s1999_s3 + $0x58] sm:$0xff] }
  0x1c   :  { %v1205_v38 = vpack.c.bf16 %v218_v36, %v217_v35  ;;  %v1207_v41 = vpack.c.bf16 %v236_v40, %v235_v39  ;;  %v346_v43 = vld [vmem:[%s2000_s5 + $0x48] sm:$0xff]  ;;  %v219_v44 = vld [vmem:[%s1999_s3 + $0x50] sm:$0xff]  ;;  %v237_v48 = vld [vmem:[%s1999_s3 + $0xe0] sm:$0xff] }
  0x1d   :  { %1182 = vmatpush3.bf16.msra.mxu0 %v1181_v8  ;;  %1204 = vmatprep.subr.bf16.mxu1 %v1203_v33  ;;  %v1235_v45 = vpack.c.bf16 %v346_v43, %v345_v42  ;;  %v1209_v47 = vpack.c.bf16 %v220_v46, %v219_v44  ;;  %v238_v49 = vld [vmem:[%s1999_s3 + $0xe8] sm:$0xff]  ;;  %v347_v50 = vld [vmem:[%s2000_s5 + $0x50] sm:$0xff]  ;;  %v348_v52 = vld [vmem:[%s2000_s5 + $0x58] sm:$0xff] }
  0x1e   :  { %1184 = vmatprep.subr.bf16.mxu0 %v1183_v10  ;;  %v1211_v51 = vpack.c.bf16 %v238_v49, %v237_v48  ;;  %v221_v53 = vld [vmem:[%s1999_s3 + $0x60] sm:$0xff]  ;;  %v222_v54 = vld [vmem:[%s1999_s3 + $0x68] sm:$0xff]  ;;  %v1239_v55 = vpack.c.bf16 %v348_v52, %v347_v50  ;;  %v239_v57 = vld [vmem:[%s1999_s3 + $0xf0] sm:$0xff] }
  0x1f   :  { %1206 = vmatpush3.bf16.msra.mxu1 %v1205_v38  ;;  %v1213_v56 = vpack.c.bf16 %v222_v54, %v221_v53  ;;  %v240_v58 = vld [vmem:[%s1999_s3 + $0xf8] sm:$0xff]  ;;  %v350_v61 = vld [vmem:[%s2000_s5 + $0x68] sm:$0xff]  ;;  %v223_v62 = vld [vmem:[%s1999_s3 + $0x70] sm:$0xff] }
  0x20   :  { %1208 = vmatprep.subr.bf16.mxu1 %v1207_v41  ;;  %v1215_v60 = vpack.c.bf16 %v240_v58, %v239_v57  ;;  %v224_v63 = vld [vmem:[%s1999_s3 + $0x78] sm:$0xff]  ;;  %v351_v2 = vld [vmem:[%s2000_s5 + $0x70] sm:$0xff]  ;;  %v481_v5 = vld [vmem:[%s2001_s7 + $0x80] sm:$0xff] }
  0x21   :  { %1186 = vmatpush3.bf16.msra.mxu0 %v1185_v15  ;;  %v1217_v1 = vpack.c.bf16 %v224_v63, %v223_v62  ;;  %v352_v3 = vld [vmem:[%s2000_s5 + $0x78] sm:$0xff]  ;;  %v482_v6 = vld [vmem:[%s2001_s7 + $0x88] sm:$0xff]  ;;  %v857_v9 = vld [vmem:[%s2002_s2] ss:$0 sm:$0xff] }
  0x22   :  { %1220 = vmatprep.subr.bf16.mxu0 %v1219_v16  ;;  %v1247_v4 = vpack.c.bf16 %v352_v3, %v351_v2  ;;  %v1251_v7 = vpack.c.bf16 %v482_v6, %v481_v5  ;;  %v465_v22 = vld [vmem:[%s2001_s7] sm:$0xff]  ;;  %v466_v23 = vld [vmem:[%s2001_s7 + $0x8] sm:$0xff]  ;;  %v467_v33 = vld [vmem:[%s2001_s7 + $0x10] sm:$0xff] }
  0x23   :  { %1210 = vmatpush3.bf16.msra.mxu1 %v1209_v47  ;;  %v468_v34 = vld [vmem:[%s2001_s7 + $0x18] sm:$0xff]  ;;  %v485_v42 = vld [vmem:[%s2001_s7 + $0xa0] sm:$0xff]  ;;  %v486_v43 = vld [vmem:[%s2001_s7 + $0xa8] sm:$0xff] }
  0x24   :  { %173 = vmatmul.mubr.f32.vlgmr.msra.gmra.mrb[0].mxu0 %v65_v19  ;;  %1212 = vmatprep.subr.bf16.mxu1 %v1211_v51  ;;  %v1259_v44 = vpack.c.bf16 %v486_v43, %v485_v42  ;;  %v470_v46 = vld [vmem:[%s2001_s7 + $0x28] sm:$0xff]  ;;  %v487_v48 = vld [vmem:[%s2001_s7 + $0xb0] sm:$0xff]  ;;  %v488_v49 = vld [vmem:[%s2001_s7 + $0xb8] sm:$0xff] }
  0x25   :  { %177 = vmatprep.mubr.f32.mxu0 %v1591_v20  ;;  %1222 = vmatpush3.bf16.msra.mxu0 %v1219_v16  ;;  %v1263_v50 = vpack.c.bf16 %v488_v49, %v487_v48  ;;  %v471_v51 = vld [vmem:[%s2001_s7 + $0x30] sm:$0xff]  ;;  %v472_v52 = vld [vmem:[%s2001_s7 + $0x38] sm:$0xff]  ;;  %v490_v57 = vld [vmem:[%s2001_s7 + $0xc8] sm:$0xff] }
  0x26   :  { %1224 = vmatprep.subr.bf16.mxu0 %v1223_v21  ;;  %v1265_v53 = vpack.c.bf16 %v472_v52, %v471_v51  ;;  %v491_v62 = vld [vmem:[%s2001_s7 + $0xd0] sm:$0xff]  ;;  %v492_v63 = vld [vmem:[%s2001_s7 + $0xd8] sm:$0xff]  ;;  %v493_v6 = vld [vmem:[%s2001_s7 + $0xe0] sm:$0xff] }
  0x27   :  { %1214 = vmatpush3.bf16.msra.mxu1 %v1213_v56  ;;  %v489_v56 = vld [vmem:[%s2001_s7 + $0xc0] sm:$0xff]  ;;  %v476_v2 = vld [vmem:[%s2001_s7 + $0x58] sm:$0xff] }
  0x28   :  { %178 = vmatmul.mubr.f32.gmra.mrb[2].mxu0 %v66_v24  ;;  %1216 = vmatprep.subr.bf16.mxu1 %v1215_v60  ;;  %v483_v24 = vld [vmem:[%s2001_s7 + $0x90] sm:$0xff]  ;;  %v1267_v58 = vpack.c.bf16 %v490_v57, %v489_v56  ;;  %v474_v60 = vld [vmem:[%s2001_s7 + $0x48] sm:$0xff] }
  0x29   :  { %182 = vmatprep.mubr.f32.mxu0 %v1600_v25  ;;  %1226 = vmatpush3.bf16.msra.mxu0 %v1223_v21 }
  0x2a   :  { %1228 = vmatprep.subr.bf16.mxu0 %v1227_v26 }
  0x2b   :  { %1218 = vmatpush3.bf16.msra.mxu1 %v1217_v1  ;;  %v475_v1 = vld [vmem:[%s2001_s7 + $0x50] sm:$0xff] }
  0x2c   :  { %183 = vmatmul.mubr.f32.gmra.mrb[4].mxu0 %v67_v27  ;;  %1252 = vmatprep.subr.bf16.mxu1 %v1251_v7  ;;  %v494_v7 = vld [vmem:[%s2001_s7 + $0xe8] sm:$0xff] }
  0x2d   :  { %187 = vmatprep.mubr.f32.mxu0 %v1603_v28  ;;  %1230 = vmatpush3.bf16.msra.mxu0 %v1227_v26 }
  0x2e   :  { %1232 = vmatprep.subr.bf16.mxu0 %v1231_v37 }
  0x30   :  { %188 = vmatmul.mubr.f32.gmra.mrb[6].mxu0 %v68_v29  ;;  %v1253_v29 = vpack.c.bf16 %v466_v23, %v465_v22  ;;  %v606_v22 = vld [vmem:[%s2003_s9 + $0x8] sm:$0xff]  ;;  %v623_v23 = vld [vmem:[%s2003_s9 + $0x90] sm:$0xff] }
  0x31   :  { %1111 = vmatprep.mubr.f32.mxu0 %v61_v59  ;;  %1234 = vmatpush3.bf16.msra.mxu0 %v1231_v37  ;;  %v349_v59 = vld [vmem:[%s2000_s5 + $0x60] sm:$0xff]  ;;  %v1257_v37 = vpack.c.bf16 %v468_v34, %v467_v33  ;;  %v610_v34 = vld [vmem:[%s2003_s9 + $0x28] sm:$0xff] }
  0x32   :  { %1236 = vmatprep.subr.bf16.mxu0 %v1235_v45  ;;  %v1243_v0 = vpack.c.bf16 %v350_v61, %v349_v59  ;;  %v473_v59 = vld [vmem:[%s2001_s7 + $0x40] sm:$0xff] }
  0x33   :  { %v1269_v61 = vpack.c.bf16 %v474_v60, %v473_v59  ;;  %v609_v33 = vld [vmem:[%s2003_s9 + $0x20] sm:$0xff] }
  0x35   :  { %1238 = vmatpush3.bf16.msra.mxu0 %v1235_v45  ;;  %v469_v45 = vld [vmem:[%s2001_s7 + $0x20] sm:$0xff] }
  0x36   :  { %1240 = vmatprep.subr.bf16.mxu0 %v1239_v55  ;;  %v1261_v47 = vpack.c.bf16 %v470_v46, %v469_v45 }
  0x39   :  { %1242 = vmatpush3.bf16.msra.mxu0 %v1239_v55 }
  0x3a   :  { %1244 = vmatprep.subr.bf16.mxu0 %v1243_v0 }
  0x3d   :  { %1246 = vmatpush3.bf16.msra.mxu0 %v1243_v0  ;;  %v1271_v0 = vpack.c.bf16 %v492_v63, %v491_v62 }
  0x3e   :  { %1248 = vmatprep.subr.bf16.mxu0 %v1247_v4 }
  0x41   :  { %1250 = vmatpush3.bf16.msra.mxu0 %v1247_v4  ;;  %v1273_v4 = vpack.c.bf16 %v476_v2, %v475_v1 }
  0x44   :  { %1112 = vmatmul.mubr.f32.vlgmr.msra.gmra.mrb[8].mxu0 %v1591_v20 }
  0x45   :  { %1114 = vmatprep.mubr.f32.mxu0 %v1600_v25  ;;  %v484_v25 = vld [vmem:[%s2001_s7 + $0x98] sm:$0xff] }
  0x46   :  { %v1255_v32 = vpack.c.bf16 %v484_v25, %v483_v24  ;;  %v624_v24 = vld [vmem:[%s2003_s9 + $0x98] sm:$0xff] }
  0x48   :  { %1115 = vmatmul.mubr.f32.gmra.mrb[10].mxu0 %v1603_v28 }
  0xf7   :  { %v895_v8 = vpop.f32.mrb[0].mxu0 }
  0xf8   :  { %v896_v10 = vpop.f32.mrb[1].mxu0 }
  0xf9   :  { %v897_v11 = vadd.f32 %v896_v10, %v895_v8  ;;  %v1275_v8 = vpack.c.bf16 %v494_v7, %v493_v6  ;;  %v478_v10 = vld [vmem:[%s2001_s7 + $0x68] sm:$0xff] }
  0xfb   :  { %v175_v12 = vadd.f32 %v897_v11, %v857_v9  ;;  %v898_v13 = vpop.f32.mrb[2].mxu0 }
  0xfc   :  { %v899_v14 = vpop.f32.mrb[3].mxu0 }
  0xfd   :  { %v193_v15 = vmax.f32 %v175_v12, 0.0  ;;  %v900_v16 = vadd.f32 %v899_v14, %v898_v13  ;;  %v495_v12 = vld [vmem:[%s2001_s7 + $0xf0] sm:$0xff]  ;;  %v496_v13 = vld [vmem:[%s2001_s7 + $0xf8] sm:$0xff] }
  0xfe   :  { %v1279_v14 = vpack.c.bf16 %v496_v13, %v495_v12 }
  0xff   :  { %197 = vst [vmem:[#allocation2 + $0x8] sm:$0xff] %v193_v15  ;;  %v180_v17 = vadd.f32 %v900_v16, %v857_v9  ;;  %v901_v18 = vpop.f32.mrb[4].mxu0  ;;  %312 = vmatprep.mubr.f32.mxu1 %v193_v15  ;;  %v479_v15 = vld [vmem:[%s2001_s7 + $0x70] sm:$0xff]  ;;  %v480_v16 = vld [vmem:[%s2001_s7 + $0x78] sm:$0xff] }
 0x100   :  { %v902_v19 = vpop.f32.mrb[5].mxu0 }
 0x101   :  { %v194_v20 = vmax.f32 %v180_v17, 0.0  ;;  %v903_v21 = vadd.f32 %v902_v19, %v901_v18  ;;  %v1281_v17 = vpack.c.bf16 %v480_v16, %v479_v15  ;;  %v621_v18 = vld [vmem:[%s2003_s9 + $0x80] sm:$0xff]  ;;  %v622_v19 = vld [vmem:[%s2003_s9 + $0x88] sm:$0xff]  ;;  %v628_v15 = vld [vmem:[%s2003_s9 + $0xb8] sm:$0xff] }
 0x103   :  { %198 = vst [vmem:[#allocation2 + $0x10] sm:$0xff] %v194_v20  ;;  %v185_v26 = vadd.f32 %v903_v21, %v857_v9  ;;  %v904_v27 = vpop.f32.mrb[6].mxu0  ;;  %v1283_v21 = vpack.c.bf16 %v622_v19, %v621_v18  ;;  %v612_v18 = vld [vmem:[%s2003_s9 + $0x38] sm:$0xff] }
 0x104   :  { %v905_v28 = vpop.f32.mrb[7].mxu0 }
 0x105   :  { %v195_v30 = vmax.f32 %v185_v26, 0.0  ;;  %v906_v31 = vadd.f32 %v905_v28, %v904_v27  ;;  %v1287_v26 = vpack.c.bf16 %v624_v24, %v623_v23  ;;  %v607_v27 = vld [vmem:[%s2003_s9 + $0x10] sm:$0xff]  ;;  %v608_v28 = vld [vmem:[%s2003_s9 + $0x18] sm:$0xff]  ;;  %1284 = vmatprep.subr.bf16.mxu0 %v1283_v21  ;;  %v630_v21 = vld [vmem:[%s2003_s9 + $0xc8] sm:$0xff] }
 0x106   :  { %v201_v35 = vld [vmem:[#allocation2 + $0x7] sm:$0xff] }
 0x107   :  { %199 = vst [vmem:[#allocation2 + $0x28] sm:$0xff] %v195_v30  ;;  %v190_v36 = vadd.f32 %v906_v31, %v857_v9  ;;  %313 = vmatmul.mubr.f32.vlgmr.msra.gmra.mrb[0].mxu1 %v201_v35  ;;  %v477_v9 = vld [vmem:[%s2001_s7 + $0x60] sm:$0xff]  ;;  %v1289_v31 = vpack.c.bf16 %v608_v28, %v607_v27  ;;  %v1293_v35 = vpack.c.bf16 %v610_v34, %v609_v33  ;;  %v614_v24 = vld [vmem:[%s2003_s9 + $0x48] sm:$0xff]  ;;  %v632_v27 = vld [vmem:[%s2003_s9 + $0xd8] sm:$0xff] }
 0x108   :  { %317 = vmatprep.mubr.f32.mxu1 %v194_v20  ;;  %1254 = vmatpush3.bf16.msra.mxu1 %v1253_v29  ;;  %v1277_v11 = vpack.c.bf16 %v478_v10, %v477_v9  ;;  %v605_v20 = vld [vmem:[%s2003_s9] sm:$0xff]  ;;  %v634_v33 = vld [vmem:[%s2003_s9 + $0xe8] sm:$0xff] }
 0x109   :  { %v196_v38 = vmax.f32 %v190_v36, 0.0  ;;  %1256 = vmatprep.subr.bf16.mxu1 %v1255_v32  ;;  %v1285_v25 = vpack.c.bf16 %v606_v22, %v605_v20  ;;  %v625_v29 = vld [vmem:[%s2003_s9 + $0xa0] sm:$0xff] }
 0x10a   :  { %v202_v39 = vld [vmem:[#allocation2 + $0xf] sm:$0xff]  ;;  %v629_v20 = vld [vmem:[%s2003_s9 + $0xc0] sm:$0xff] }
 0x10b   :  { %200 = vst [vmem:[#allocation2 + $0x30] sm:$0xff] %v196_v38  ;;  %318 = vmatmul.mubr.f32.gmra.mrb[2].mxu1 %v202_v39  ;;  %1286 = vmatpush3.bf16.msra.mxu0 %v1285_v25  ;;  %v859_v39 = vld [vmem:[%s2005_s6] ss:$0 sm:$0xff]  ;;  %v1299_v22 = vpack.c.bf16 %v630_v21, %v629_v20 }
 0x10c   :  { %322 = vmatprep.mubr.f32.mxu1 %v195_v30  ;;  %1258 = vmatpush3.bf16.msra.mxu1 %v1257_v37  ;;  %v626_v30 = vld [vmem:[%s2003_s9 + $0xa8] sm:$0xff]  ;;  %v858_v37 = vld [vmem:[%s2004_s4] ss:$0 sm:$0xff] }
 0x10d   :  { %1260 = vmatprep.subr.bf16.mxu1 %v1259_v44  ;;  %1288 = vmatprep.subr.bf16.mxu0 %v1287_v26  ;;  %v1291_v32 = vpack.c.bf16 %v626_v30, %v625_v29  ;;  %v613_v23 = vld [vmem:[%s2003_s9 + $0x40] sm:$0xff]  ;;  %v631_v26 = vld [vmem:[%s2003_s9 + $0xd0] sm:$0xff]  ;;  %v616_v30 = vld [vmem:[%s2003_s9 + $0x58] sm:$0xff] }
 0x10e   :  { %v203_v40 = vld [vmem:[#allocation2 + $0x27] sm:$0xff]  ;;  %v1301_v25 = vpack.c.bf16 %v614_v24, %v613_v23  ;;  %v1303_v28 = vpack.c.bf16 %v632_v27, %v631_v26  ;;  %v615_v29 = vld [vmem:[%s2003_s9 + $0x50] sm:$0xff] }
 0x10f   :  { %323 = vmatmul.mubr.f32.gmra.mrb[4].mxu1 %v203_v40  ;;  %1290 = vmatpush3.bf16.msra.mxu0 %v1289_v31  ;;  %v1305_v31 = vpack.c.bf16 %v616_v30, %v615_v29  ;;  %v749_v29 = vld [vmem:[%s2006_s11 + $0x40] sm:$0xff]  ;;  %v750_v30 = vld [vmem:[%s2006_s11 + $0x48] sm:$0xff] }
 0x110   :  { %327 = vmatprep.mubr.f32.mxu1 %v196_v38  ;;  %1262 = vmatpush3.bf16.msra.mxu1 %v1261_v47 }
 0x111   :  { %1264 = vmatprep.subr.bf16.mxu1 %v1263_v50  ;;  %1292 = vmatprep.subr.bf16.mxu0 %v1291_v32  ;;  %v633_v32 = vld [vmem:[%s2003_s9 + $0xe0] sm:$0xff] }
 0x112   :  { %v204_v41 = vld [vmem:[#allocation2 + $0x2f] sm:$0xff]  ;;  %v1307_v34 = vpack.c.bf16 %v634_v33, %v633_v32  ;;  %v752_v33 = vld [vmem:[%s2006_s11 + $0x58] sm:$0xff] }
 0x113   :  { %328 = vmatmul.mubr.f32.gmra.mrb[6].mxu1 %v204_v41  ;;  %1294 = vmatpush3.bf16.msra.mxu0 %v1293_v35  ;;  %v617_v35 = vld [vmem:[%s2003_s9 + $0x60] sm:$0xff]  ;;  %v751_v32 = vld [vmem:[%s2006_s11 + $0x50] sm:$0xff] }
 0x114   :  { %1266 = vmatpush3.bf16.msra.mxu1 %v1265_v53 }
 0x115   :  { %1268 = vmatprep.subr.bf16.mxu1 %v1267_v58 }
 0x117   :  { %v1738_v54 = vpop.f32.mrb[8].mxu0 }
 0x118   :  { %v1740_v55 = vpop.f32.mrb[9].mxu0  ;;  %1270 = vmatpush3.bf16.msra.mxu1 %v1269_v61  ;;  %v432_v47 = vadd.f32 %v1738_v54, %v859_v39 }
 0x119   :  { %1272 = vmatprep.subr.bf16.mxu1 %v1271_v0  ;;  %v427_v43 = vadd.f32 %v859_v39, %v1740_v55 }
 0x11b   :  { %v1766_v3 = vpop.f32.mrb[10].mxu0 }
 0x11c   :  { %v1768_v5 = vpop.f32.mrb[11].mxu0  ;;  %1274 = vmatpush3.bf16.msra.mxu1 %v1273_v4  ;;  %v442_v63 = vadd.f32 %v1766_v3, %v859_v39 }
 0x11d   :  { %1276 = vmatprep.subr.bf16.mxu1 %v1275_v8  ;;  %v437_v59 = vadd.f32 %v859_v39, %v1768_v5  ;;  %v636_v39 = vld [vmem:[%s2003_s9 + $0xf8] sm:$0xff] }
 0x120   :  { %1278 = vmatpush3.bf16.msra.mxu1 %v1277_v11 }
 0x121   :  { %1280 = vmatprep.subr.bf16.mxu1 %v1279_v14  ;;  %v627_v14 = vld [vmem:[%s2003_s9 + $0xb0] sm:$0xff] }
 0x122   :  { %v1295_v16 = vpack.c.bf16 %v628_v15, %v627_v14 }
 0x124   :  { %1282 = vmatpush3.bf16.msra.mxu1 %v1281_v17  ;;  %v611_v17 = vld [vmem:[%s2003_s9 + $0x30] sm:$0xff]  ;;  %1296 = vmatprep.subr.bf16.mxu0 %v1295_v16 }
 0x125   :  { %v1297_v19 = vpack.c.bf16 %v612_v18, %v611_v17 }
 0x127   :  { %1298 = vmatpush3.bf16.msra.mxu0 %v1297_v19 }
 0x128   :  { %1300 = vmatprep.subr.bf16.mxu0 %v1299_v22 }
 0x12b   :  { %1302 = vmatpush3.bf16.msra.mxu0 %v1301_v25 }
 0x12c   :  { %1304 = vmatprep.subr.bf16.mxu0 %v1303_v28 }
 0x12f   :  { %1306 = vmatpush3.bf16.msra.mxu0 %v1305_v31  ;;  %v1331_v31 = vpack.c.bf16 %v750_v30, %v749_v29 }
 0x130   :  { %1308 = vmatprep.subr.bf16.mxu0 %v1307_v34  ;;  %v1335_v34 = vpack.c.bf16 %v752_v33, %v751_v32 }
 0x1da   :  { %v939_v36 = vpop.f32.mrb[0].mxu1 }
 0x1db   :  { %v940_v38 = vpop.f32.mrb[1].mxu1 }
 0x1dc   :  { %v941_v40 = vadd.f32 %v940_v38, %v939_v36  ;;  %v618_v36 = vld [vmem:[%s2003_s9 + $0x68] sm:$0xff]  ;;  %v635_v38 = vld [vmem:[%s2003_s9 + $0xf0] sm:$0xff] }
 0x1de   :  { %v315_v41 = vadd.f32 %v941_v40, %v858_v37  ;;  %v942_v42 = vpop.f32.mrb[2].mxu1  ;;  %v1311_v40 = vpack.c.bf16 %v636_v39, %v635_v38  ;;  %v755_v38 = vld [vmem:[%s2006_s11 + $0x70] sm:$0xff]  ;;  %v756_v39 = vld [vmem:[%s2006_s11 + $0x78] sm:$0xff] }
 0x1df   :  { %v943_v44 = vpop.f32.mrb[3].mxu1 }
 0x1e0   :  { %v333_v45 = vmax.f32 %v315_v41, 0.0  ;;  %v944_v46 = vadd.f32 %v943_v44, %v942_v42  ;;  %v619_v41 = vld [vmem:[%s2003_s9 + $0x70] sm:$0xff]  ;;  %v620_v42 = vld [vmem:[%s2003_s9 + $0x78] sm:$0xff]  ;;  %v741_v44 = vld [vmem:[%s2006_s11] sm:$0xff] }
 0x1e2   :  { %v320_v48 = vadd.f32 %v944_v46, %v858_v37  ;;  %v1838_v49 = vadd.f32 %v427_v43, %v333_v45  ;;  %v945_v50 = vpop.f32.mrb[4].mxu1  ;;  %v1313_v43 = vpack.c.bf16 %v620_v42, %v619_v41  ;;  %v742_v45 = vld [vmem:[%s2006_s11 + $0x8] sm:$0xff]  ;;  %v743_v46 = vld [vmem:[%s2006_s11 + $0x10] sm:$0xff]  ;;  %v861_v42 = vld [vmem:[%s2008_s10] ss:$0 sm:$0xff] }
 0x1e3   :  { %v946_v51 = vpop.f32.mrb[5].mxu1 }
 0x1e4   :  { %v334_v52 = vmax.f32 %v320_v48, 0.0  ;;  %v449_v53 = vmax.f32 %v1838_v49, 0.0  ;;  %v947_v56 = vadd.f32 %v946_v51, %v945_v50  ;;  %v744_v48 = vld [vmem:[%s2006_s11 + $0x18] sm:$0xff]  ;;  %v745_v51 = vld [vmem:[%s2006_s11 + $0x20] sm:$0xff] }
 0x1e5   :  { %v1319_v50 = vpack.c.bf16 %v744_v48, %v743_v46 }
 0x1e6   :  { %v1841_v57 = vadd.f32 %v432_v47, %v334_v52  ;;  %453 = vst [vmem:[#allocation2 + $0x8] sm:$0xff] %v449_v53  ;;  %v325_v55 = vadd.f32 %v947_v56, %v858_v37  ;;  %v948_v58 = vpop.f32.mrb[6].mxu1  ;;  %v1315_v47 = vpack.c.bf16 %v742_v45, %v741_v44  ;;  %v746_v52 = vld [vmem:[%s2006_s11 + $0x28] sm:$0xff] }
 0x1e7   :  { %v949_v60 = vpop.f32.mrb[7].mxu1  ;;  %v1323_v56 = vpack.c.bf16 %v746_v52, %v745_v51 }
 0x1e8   :  { %v450_v54 = vmax.f32 %v1841_v57, 0.0  ;;  %v335_v61 = vmax.f32 %v325_v55, 0.0  ;;  %v950_v62 = vadd.f32 %v949_v60, %v948_v58  ;;  %1316 = vmatprep.subr.bf16.mxu1 %v1315_v47  ;;  %v747_v55 = vld [vmem:[%s2006_s11 + $0x30] sm:$0xff]  ;;  %v748_v58 = vld [vmem:[%s2006_s11 + $0x38] sm:$0xff] }
 0x1ea   :  { %454 = vst [vmem:[#allocation2 + $0x10] sm:$0xff] %v450_v54  ;;  %v330_v0 = vadd.f32 %v950_v62, %v858_v37  ;;  %v1850_v1 = vadd.f32 %v437_v59, %v335_v61  ;;  %v1309_v37 = vpack.c.bf16 %v618_v36, %v617_v35  ;;  %v1327_v59 = vpack.c.bf16 %v748_v58, %v747_v55  ;;  %v860_v61 = vld [vmem:[%s2007_s8] ss:$0 sm:$0xff]  ;;  %v754_v36 = vld [vmem:[%s2006_s11 + $0x68] sm:$0xff] }
 0x1eb   :  { %v753_v35 = vld [vmem:[%s2006_s11 + $0x60] sm:$0xff] }
 0x1ec   :  { %v336_v2 = vmax.f32 %v330_v0, 0.0  ;;  %v451_v4 = vmax.f32 %v1850_v1, 0.0  ;;  %1310 = vmatpush3.bf16.msra.mxu0 %v1309_v37  ;;  %v1339_v37 = vpack.c.bf16 %v754_v36, %v753_v35 }
 0x1ed   :  { %v457_v8 = vld [vmem:[#allocation2 + $0x7] sm:$0xff]  ;;  %1312 = vmatprep.subr.bf16.mxu0 %v1311_v40  ;;  %v1343_v40 = vpack.c.bf16 %v756_v39, %v755_v38 }
 0x1ee   :  { %v1853_v6 = vadd.f32 %v442_v63, %v336_v2  ;;  %455 = vst [vmem:[#allocation2 + $0x28] sm:$0xff] %v451_v4 }
 0x1f0   :  { %v452_v5 = vmax.f32 %v1853_v6, 0.0  ;;  %1314 = vmatpush3.bf16.msra.mxu0 %v1313_v43 }
 0x1f1   :  { %v461_v7 = vld [vmem:[#allocation2 + $0x9] sm:$0xff]  ;;  %v462_v3 = vld [vmem:[#allocation2 + $0x11] sm:$0xff] }
 0x1f2   :  { %456 = vst [vmem:[#allocation2 + $0x30] sm:$0xff] %v452_v5  ;;  %568 = vmatprep.mubr.f32.mxu1 %v461_v7  ;;  %v458_v9 = vld [vmem:[#allocation2 + $0xf] sm:$0xff] }
 0x1f3   :  { %569 = vmatmul.mubr.f32.vlgmr.msra.gmra.mrb[8].mxu1 %v457_v8 }
 0x1f4   :  { %573 = vmatprep.mubr.f32.mxu1 %v462_v3  ;;  %1318 = vmatpush3.bf16.msra.mxu1 %v1315_v47 }
 0x1f5   :  { %v459_v11 = vld [vmem:[#allocation2 + $0x27] sm:$0xff]  ;;  %1320 = vmatprep.subr.bf16.mxu1 %v1319_v50 }
 0x1f7   :  { %574 = vmatmul.mubr.f32.gmra.mrb[10].mxu1 %v458_v9 }
 0x1f8   :  { %1322 = vmatpush3.bf16.msra.mxu1 %v1319_v50 }
 0x1f9   :  { %v463_v10 = vld [vmem:[#allocation2 + $0x29] sm:$0xff]  ;;  %v464_v12 = vld [vmem:[#allocation2 + $0x31] sm:$0xff]  ;;  %1324 = vmatprep.subr.bf16.mxu1 %v1323_v56 }
 0x1fa   :  { %578 = vmatprep.mubr.f32.mxu1 %v463_v10  ;;  %v460_v13 = vld [vmem:[#allocation2 + $0x2f] sm:$0xff] }
 0x1fb   :  { %579 = vmatmul.mubr.f32.gmra.mrb[12].mxu1 %v459_v11 }
 0x1fc   :  { %583 = vmatprep.mubr.f32.mxu1 %v464_v12  ;;  %1326 = vmatpush3.bf16.msra.mxu1 %v1323_v56 }
 0x1fd   :  { %1328 = vmatprep.subr.bf16.mxu1 %v1327_v59 }
 0x1ff   :  { %584 = vmatmul.mubr.f32.gmra.mrb[14].mxu1 %v460_v13 }
 0x200   :  { %1330 = vmatpush3.bf16.msra.mxu1 %v1327_v59 }
 0x201   :  { %1332 = vmatprep.subr.bf16.mxu1 %v1331_v31 }
 0x204   :  { %1334 = vmatpush3.bf16.msra.mxu1 %v1331_v31 }
 0x205   :  { %1336 = vmatprep.subr.bf16.mxu1 %v1335_v34 }
 0x208   :  { %1338 = vmatpush3.bf16.msra.mxu1 %v1335_v34 }
 0x209   :  { %1340 = vmatprep.subr.bf16.mxu1 %v1339_v37 }
 0x20c   :  { %1342 = vmatpush3.bf16.msra.mxu1 %v1339_v37 }
 0x20d   :  { %1344 = vmatprep.subr.bf16.mxu1 %v1343_v40 }
 0x210   :  { %1346 = vmatpush3.bf16.msra.mxu1 %v1343_v40 }
 0x2c6   :  { %v1003_v60 = vpop.f32.mrb[8].mxu1 }
 0x2c7   :  { %v1004_v62 = vpop.f32.mrb[9].mxu1 }
 0x2c8   :  { %v1005_v63 = vadd.f32 %v1004_v62, %v1003_v60 }
 0x2ca   :  { %v571_v0 = vadd.f32 %v1005_v63, %v860_v61  ;;  %v1006_v2 = vpop.f32.mrb[10].mxu1 }
 0x2cb   :  { %v1007_v7 = vpop.f32.mrb[11].mxu1 }
 0x2cc   :  { %v589_v8 = vmax.f32 %v571_v0, 0.0  ;;  %v1008_v3 = vadd.f32 %v1007_v7, %v1006_v2 }
 0x2ce   :  { %593 = vst [vmem:[#allocation2 + $0x8] sm:$0xff] %v589_v8  ;;  %v576_v9 = vadd.f32 %v1008_v3, %v860_v61  ;;  %v1009_v10 = vpop.f32.mrb[12].mxu1 }
 0x2cf   :  { %v1010_v11 = vpop.f32.mrb[13].mxu1 }
 0x2d0   :  { %v590_v12 = vmax.f32 %v576_v9, 0.0  ;;  %v1011_v13 = vadd.f32 %v1010_v11, %v1009_v10 }
 0x2d2   :  { %594 = vst [vmem:[#allocation2 + $0x10] sm:$0xff] %v590_v12  ;;  %v581_v14 = vadd.f32 %v1011_v13, %v860_v61  ;;  %v1012_v15 = vpop.f32.mrb[14].mxu1 }
 0x2d3   :  { %v1013_v16 = vpop.f32.mrb[15].mxu1 }
 0x2d4   :  { %v591_v17 = vmax.f32 %v581_v14, 0.0  ;;  %v1014_v18 = vadd.f32 %v1013_v16, %v1012_v15 }
 0x2d5   :  { %v597_v22 = vld [vmem:[#allocation2 + $0x7] sm:$0xff] }
 0x2d6   :  { %595 = vst [vmem:[#allocation2 + $0x28] sm:$0xff] %v591_v17  ;;  %v586_v19 = vadd.f32 %v1014_v18, %v860_v61 }
 0x2d8   :  { %v592_v20 = vmax.f32 %v586_v19, 0.0 }
 0x2d9   :  { %v601_v21 = vld [vmem:[#allocation2 + $0x9] sm:$0xff]  ;;  %v602_v23 = vld [vmem:[#allocation2 + $0x11] sm:$0xff] }
 0x2da   :  { %596 = vst [vmem:[#allocation2 + $0x30] sm:$0xff] %v592_v20  ;;  %708 = vmatprep.mubr.f32.mxu0 %v601_v21  ;;  %v598_v24 = vld [vmem:[#allocation2 + $0xf] sm:$0xff] }
 0x2db   :  { %709 = vmatmul.mubr.f32.vlgmr.msra.gmra.mrb[12].mxu0 %v597_v22 }
 0x2dc   :  { %713 = vmatprep.mubr.f32.mxu0 %v602_v23 }
 0x2dd   :  { %v599_v26 = vld [vmem:[#allocation2 + $0x27] sm:$0xff] }
 0x2df   :  { %714 = vmatmul.mubr.f32.gmra.mrb[14].mxu0 %v598_v24 }
 0x2e1   :  { %v603_v25 = vld [vmem:[#allocation2 + $0x29] sm:$0xff]  ;;  %v604_v27 = vld [vmem:[#allocation2 + $0x31] sm:$0xff] }
 0x2e2   :  { %718 = vmatprep.mubr.f32.mxu0 %v603_v25  ;;  %v600_v28 = vld [vmem:[#allocation2 + $0x2f] sm:$0xff] }
 0x2e3   :  { %719 = vmatmul.mubr.f32.gmra.mrb[16].mxu0 %v599_v26 }
 0x2e4   :  { %723 = vmatprep.mubr.f32.mxu0 %v604_v27 }
 0x2e7   :  { %724 = vmatmul.mubr.f32.gmra.mrb[18].mxu0 %v600_v28 }
 0x3ae   :  { %v1047_v41 = vpop.f32.mrb[12].mxu0 }
 0x3af   :  { %v1048_v43 = vpop.f32.mrb[13].mxu0 }
 0x3b0   :  { %v1049_v44 = vadd.f32 %v1048_v43, %v1047_v41 }
 0x3b2   :  { %v711_v45 = vadd.f32 %v1049_v44, %v861_v42  ;;  %v1050_v46 = vpop.f32.mrb[14].mxu0 }
 0x3b3   :  { %v1051_v47 = vpop.f32.mrb[15].mxu0 }
 0x3b4   :  { %v729_v48 = vmax.f32 %v711_v45, 0.0  ;;  %v1052_v50 = vadd.f32 %v1051_v47, %v1050_v46 }
 0x3b6   :  { %v716_v51 = vadd.f32 %v1052_v50, %v861_v42  ;;  %v1053_v52 = vpop.f32.mrb[16].mxu0  ;;  %v733_v56 = vadd.f32 %v729_v48, %v449_v53 }
 0x3b7   :  { %v1054_v55 = vpop.f32.mrb[17].mxu0 }
 0x3b8   :  { %v730_v58 = vmax.f32 %v716_v51, 0.0  ;;  %v1055_v59 = vadd.f32 %v1054_v55, %v1053_v52  ;;  %v737_v60 = vmax.f32 %v733_v56, 0.0 }
 0x3ba   :  { %v734_v61 = vadd.f32 %v730_v58, %v450_v54  ;;  %v721_v62 = vadd.f32 %v1055_v59, %v861_v42  ;;  %v1056_v63 = vpop.f32.mrb[18].mxu0  ;;  %1149 = vmatprep.mubr.f32.mxu1 %v737_v60  ;;  %v862_v54 = vld [vmem:[%s2009_s12] ss:$0 sm:$0xff] }
 0x3bb   :  { %v1057_v0 = vpop.f32.mrb[19].mxu0 }
 0x3bc   :  { %v738_v2 = vmax.f32 %v734_v61, 0.0  ;;  %v731_v7 = vmax.f32 %v721_v62, 0.0  ;;  %v1058_v8 = vadd.f32 %v1057_v0, %v1056_v63 }
 0x3be   :  { %v726_v3 = vadd.f32 %v1058_v8, %v861_v42  ;;  %1150 = vmatmul.mubr.f32.vlgmr.msra.gmra.mrb[16].mxu1 %v738_v2  ;;  %v735_v49 = vadd.f32 %v731_v7, %v451_v4 }
 0x3c0   :  { %v732_v53 = vmax.f32 %v726_v3, 0.0  ;;  %v739_v9 = vmax.f32 %v735_v49, 0.0 }
 0x3c2   :  { %1152 = vmatprep.mubr.f32.mxu1 %v739_v9  ;;  %v736_v10 = vadd.f32 %v732_v53, %v452_v5 }
 0x3c4   :  { %v740_v57 = vmax.f32 %v736_v10, 0.0 }
 0x3c6   :  { %1153 = vmatmul.mubr.f32.gmra.mrb[18].mxu1 %v740_v57 }
 0x491   :  { %v1151_v11 = vpop.f32.mrb[16].mxu1 }
 0x492   :  { %v836_v12 = vadd.f32 %v1151_v11, %v862_v54  ;;  %v830_v13 = vpop.f32.mrb[17].mxu1 }
 0x493   :  { %v831_v14 = vadd.f32 %v862_v54, %v830_v13 }
 0x494   :  { %850 = vst [vmem:[%s2010_s13 + $0x8] sm:$0xff] %v836_v12 }
 0x495   :  { %849 = vst [vmem:[%s2010_s13] sm:$0xff] %v831_v14 }
 0x499   :  { %v1154_v1 = vpop.f32.mrb[18].mxu1 }
 0x49a   :  { %v846_v4 = vadd.f32 %v1154_v1, %v862_v54  ;;  %v840_v6 = vpop.f32.mrb[19].mxu1 }
 0x49b   :  { %v841_v5 = vadd.f32 %v862_v54, %v840_v6 }
 0x49c   :  { %852 = vst [vmem:[%s2010_s13 + $0x18] sm:$0xff] %v846_v4 }
 0x49d   :  { %851 = vst [vmem:[%s2010_s13 + $0x10] sm:$0xff] %v841_v5 }

</bundles_post_ra>
